<compile_context>
chip_gen: v5e
topology: v5e:2x2
jax: 0.10.0
libtpu: 0.0.40
codegen_flags: <defaults>
</compile_context>

<pallas_src>
import jax
import jax.numpy as jnp
from jax.experimental import pallas as pl
from jax.experimental.pallas import tpu as pltpu

_LANE = 512            # last block dim: multiple of 128 -> unmasked vld/vst
_LANE_OUT = 128        # lane-dense per-sample output block width
_MAX_TILE_R = 2048     # max rows per grid step (amortizes ~0.35us step overhead)
_SUBLANE_ALIGN = 32    # block-row alignment safe for f32 / bf16 / int8 inputs
_VMEM_BUDGET = 10 * 1024 * 1024   # double-buffered input bytes (fits v5e 16 MiB default)


def _make_dice_kernel(tile_r: int, rows: int):
    """Build the kernel with static tile/row parameters closed over."""
    ragged = (rows % tile_r) != 0      # last row-chunk hangs past the real rows
    fold8 = (tile_r % 8 == 0)          # can fold whole vregs into an (8, LANE) acc
    acc_rows = 8 if fold8 else 1

    def kernel(x_ref, t_ref, dice_ref, acc_int_ref, acc_den_ref):
        # Grid = (sample i, row-chunk k). Input blocks are (1, tile_r, _LANE).
        k = pl.program_id(1)

        @pl.when(k == 0)
        def _init():
            acc_int_ref[...] = jnp.zeros_like(acc_int_ref)
            acc_den_ref[...] = jnp.zeros_like(acc_den_ref)

        x = x_ref[0].astype(jnp.float32)   # (tile_r, _LANE)
        t = t_ref[0].astype(jnp.float32)   # target.float() happens here, in-kernel

        if ragged:
            # Zero rows that lie beyond the real row count (OOB block reads are
            # undefined; masking makes the partial last chunk exact).
            row_ids = jax.lax.broadcasted_iota(jnp.int32, (tile_r, _LANE), 0)
            valid = (k * tile_r + row_ids) < rows
            x = jnp.where(valid, x, 0.0)
            t = jnp.where(valid, t, 0.0)

        prod = x * t       # intersection terms
        den = x + t        # dice only ever needs x_sum + t_sum -> one accumulator

        if fold8:
            # VALU-only fold across whole vregs; full-lane unmasked acc stores.
            acc_int_ref[...] += prod.reshape(tile_r // 8, 8, _LANE).sum(axis=0)
            acc_den_ref[...] += den.reshape(tile_r // 8, 8, _LANE).sum(axis=0)
        else:
            # Tiny-sample path (tile_r < 8 or unaligned): (1, _LANE) accumulators.
            acc_int_ref[...] += prod.sum(axis=0, keepdims=True)
            acc_den_ref[...] += den.sum(axis=0, keepdims=True)

        @pl.when(k == pl.num_programs(1) - 1)
        def _finalize():
            # Single cross-lane/sublane reduction per sample, deferred to here.
            smooth = jnp.float32(1.0)
            inter = jnp.sum(acc_int_ref[...])
            denom = jnp.sum(acc_den_ref[...])
            dice = 2.0 * (inter + smooth) / (denom + smooth)
            dice_ref[...] = jnp.broadcast_to(dice, (1, 1, _LANE_OUT)).astype(jnp.float32)

    return kernel, acc_rows


def dice_loss(input_x: jax.Array, target: jax.Array, *, max_tile_rows=None) -> jax.Array:
    """Pallas implementation of DiceLoss.forward(input, target)."""
    n = target.shape[0]
    d = 1
    for s in input_x.shape[1:]:
        d *= s

    x_flat = jnp.reshape(input_x, (n, d))
    t_flat = jnp.reshape(target, (n, d))   # keep native dtype (int8/bf16/...)

    # Lane-dense (rows, 512) slab per sample.  Only pad d up to the next
    # multiple of _LANE (< 512 elems/sample); zeros contribute nothing.
    rows = pl.cdiv(d, _LANE)
    d_pad = rows * _LANE
    if d_pad != d:
        x_flat = jnp.pad(x_flat, ((0, 0), (0, d_pad - d)))
        t_flat = jnp.pad(t_flat, ((0, 0), (0, d_pad - d)))
    x3 = jnp.reshape(x_flat, (n, rows, _LANE))
    t3 = jnp.reshape(t_flat, (n, rows, _LANE))

    # Rows per grid step: as many as the VMEM budget allows (double-buffered
    # x + t blocks), capped at _MAX_TILE_R.  If a sample fits in one step, take
    # the whole (possibly unaligned) row extent as the block (full-dim block).
    bytes_per_row = _LANE * (x_flat.dtype.itemsize + t_flat.dtype.itemsize)
    budget_rows = max(
        _SUBLANE_ALIGN,
        (_VMEM_BUDGET // (2 * bytes_per_row)) // _SUBLANE_ALIGN * _SUBLANE_ALIGN,
    )
    cap = min(_MAX_TILE_R, budget_rows)
    if max_tile_rows is not None:
        cap = min(cap, int(max_tile_rows))
    tile_r = rows if rows <= cap else cap
    num_k = pl.cdiv(rows, tile_r)   # last chunk may be ragged; masked in-kernel

    kernel, acc_rows = _make_dice_kernel(tile_r, rows)

    cost = pl.CostEstimate(
        flops=2 * n * d,
        transcendentals=0,
        bytes_accessed=n * d * (x_flat.dtype.itemsize + t_flat.dtype.itemsize)
        + n * _LANE_OUT * 4,
    )

    dice_blocks = pl.pallas_call(
        kernel,
        out_shape=jax.ShapeDtypeStruct((n, 1, _LANE_OUT), jnp.float32),
        grid_spec=pltpu.PrefetchScalarGridSpec(
            num_scalar_prefetch=0,
            grid=(n, num_k),
            in_specs=[
                pl.BlockSpec((1, tile_r, _LANE), lambda i, k: (i, k, 0)),
                pl.BlockSpec((1, tile_r, _LANE), lambda i, k: (i, k, 0)),
            ],
            out_specs=pl.BlockSpec((1, 1, _LANE_OUT), lambda i, k: (i, 0, 0)),
            scratch_shapes=[
                pltpu.VMEM((acc_rows, _LANE), jnp.float32),   # intersection acc
                pltpu.VMEM((acc_rows, _LANE), jnp.float32),   # x_sum + t_sum acc
            ],
        ),
        compiler_params=pltpu.CompilerParams(
            dimension_semantics=("parallel", "arbitrary"),
        ),
        cost_estimate=cost,
    )(x3, t3)

    dice = dice_blocks[:, 0, 0]                       # (N,) per-sample dice
    # Final O(N) combine kept in plain JAX so the N grid axis stays parallel.
    return 1.0 - jnp.sum(dice) / jnp.float32(n)


def dice_loss_ref(input_x, target):
    """Pure-JAX reference matching the PyTorch module exactly."""
    target = target.astype(jnp.float32)
    n = target.shape[0]
    smooth = 1.0
    inp = jnp.reshape(input_x, (n, -1)).astype(jnp.float32)
    tgt = jnp.reshape(target, (n, -1))
    intersection = inp * tgt
    loss = 2.0 * (jnp.sum(intersection, axis=1) + smooth) / (
        jnp.sum(inp, axis=1) + jnp.sum(tgt, axis=1) + smooth
    )
    return 1.0 - jnp.sum(loss) / n


if __name__ == "__main__":
    key = jax.random.PRNGKey(0)
    k1, k2, k3, k4 = jax.random.split(key, 4)

    # Primary test: N=2, C=4, H=W=16 (D=1024), f32 probabilities, int8 mask.
    x = jax.nn.sigmoid(jax.random.normal(k1, (2, 4, 16, 16), dtype=jnp.float32))
    t = (jax.random.uniform(k2, (2, 4, 16, 16)) > 0.5).astype(jnp.int8)

    out = jax.jit(dice_loss)(x, t)
    jax.block_until_ready(out)
    ref = dice_loss_ref(x, t)
    assert jnp.allclose(out, ref, rtol=1e-5, atol=1e-5), (out, ref)

    # Secondary test: D not a multiple of 512 + multi-chunk ragged reduction
    # path (forced small tile), f32 target -> exercises padding + tail masking.
    x2 = jax.nn.sigmoid(jax.random.normal(k3, (2, 4, 40, 40), dtype=jnp.float32))
    t2 = (jax.random.uniform(k4, (2, 4, 40, 40)) > 0.5).astype(jnp.float32)
    out2 = jax.jit(lambda a, b: dice_loss(a, b, max_tile_rows=8))(x2, t2)
    jax.block_until_ready(out2)
    ref2 = dice_loss_ref(x2, t2)
    assert jnp.allclose(out2, ref2, rtol=1e-5, atol=1e-5), (out2, ref2)

    print("KERNEL_OK")
</pallas_src>

<mosaic_0001>
module attributes {stable_mosaic.version = 11 : i64} {
  func.func @kernel(%arg0: i32, %arg1: i32, %arg2: memref<1x2x512xf32, #tpu.memory_space<vmem>>, %arg3: memref<1x2x512xi8, #tpu.memory_space<vmem>>, %arg4: memref<1x1x128xf32, #tpu.memory_space<vmem>>, %arg5: memref<1x512xf32, #tpu.memory_space<vmem>>, %arg6: memref<1x512xf32, #tpu.memory_space<vmem>>) attributes {dimension_semantics = [#tpu.dimension_semantics<parallel>, #tpu.dimension_semantics<arbitrary>], iteration_bounds = array<i64: 2, 1>, scalar_prefetch = 0 : i64, scratch_operands = 2 : i64, tpu.core_type = #tpu.core_type<tc>, window_params = [{transform_indices = @transform_0, window_bounds = array<i64: 1, 2, 512>}, {transform_indices = @transform_1, window_bounds = array<i64: 1, 2, 512>}, {transform_indices = @transform_2, window_bounds = array<i64: 1, 1, 128>}]} {
    %c0_i32 = arith.constant 0 : i32
    %0 = arith.cmpi eq, %arg1, %c0_i32 : i32
    %1 = arith.extui %0 : i1 to i32
    %c0_i32_0 = arith.constant 0 : i32
    %2 = arith.cmpi ne, %1, %c0_i32_0 : i32
    scf.if %2 {
      %cst_17 = arith.constant 0.000000e+00 : f32
      %23 = vector.broadcast %cst_17 : f32 to vector<1x512xf32>
      %c0_18 = arith.constant 0 : index
      %c0_19 = arith.constant 0 : index
      %24 = vector.load %arg5[%c0_18, %c0_19] : memref<1x512xf32, #tpu.memory_space<vmem>>, vector<1x512xf32>
      tpu.vector_store %arg5[%c0_18, %c0_19], %23 {strides = array<i32>} : memref<1x512xf32, #tpu.memory_space<vmem>>, vector<1x512xf32>,
      %cst_20 = arith.constant 0.000000e+00 : f32
      %25 = vector.broadcast %cst_20 : f32 to vector<1x512xf32>
      %c0_21 = arith.constant 0 : index
      %c0_22 = arith.constant 0 : index
      %26 = vector.load %arg6[%c0_21, %c0_22] : memref<1x512xf32, #tpu.memory_space<vmem>>, vector<1x512xf32>
      tpu.vector_store %arg6[%c0_21, %c0_22], %25 {strides = array<i32>} : memref<1x512xf32, #tpu.memory_space<vmem>>, vector<1x512xf32>,
    } else {
    }
    %c0 = arith.constant 0 : index
    %c0_1 = arith.constant 0 : index
    %c0_2 = arith.constant 0 : index
    %3 = vector.load %arg2[%c0, %c0_1, %c0_2] : memref<1x2x512xf32, #tpu.memory_space<vmem>>, vector<1x2x512xf32>
    %4 = vector.shape_cast %3 : vector<1x2x512xf32> to vector<2x512xf32>
    %c0_3 = arith.constant 0 : index
    %c0_4 = arith.constant 0 : index
    %c0_5 = arith.constant 0 : index
    %5 = vector.load %arg3[%c0_3, %c0_4, %c0_5] : memref<1x2x512xi8, #tpu.memory_space<vmem>>, vector<1x2x512xi8>
    %6 = vector.shape_cast %5 : vector<1x2x512xi8> to vector<2x512xi8>
    %7 = arith.sitofp %6 : vector<2x512xi8> to vector<2x512xf32>
    %8 = arith.mulf %4, %7 : vector<2x512xf32>
    %9 = arith.addf %4, %7 : vector<2x512xf32>
    %c0_6 = arith.constant 0 : index
    %c0_7 = arith.constant 0 : index
    %10 = vector.load %arg5[%c0_6, %c0_7] : memref<1x512xf32, #tpu.memory_space<vmem>>, vector<1x512xf32>
    %cst = arith.constant dense<0.000000e+00> : vector<512xf32>
    %11 = vector.multi_reduction <add>, %8, %cst [0] : vector<2x512xf32> to vector<512xf32>
    %12 = vector.shape_cast %11 : vector<512xf32> to vector<1x512xf32>
    %13 = arith.addf %10, %12 : vector<1x512xf32>
    %c0_8 = arith.constant 0 : index
    %c0_9 = arith.constant 0 : index
    %14 = vector.load %arg5[%c0_8, %c0_9] : memref<1x512xf32, #tpu.memory_space<vmem>>, vector<1x512xf32>
    tpu.vector_store %arg5[%c0_8, %c0_9], %13 {strides = array<i32>} : memref<1x512xf32, #tpu.memory_space<vmem>>, vector<1x512xf32>,
    %c0_10 = arith.constant 0 : index
    %c0_11 = arith.constant 0 : index
    %15 = vector.load %arg6[%c0_10, %c0_11] : memref<1x512xf32, #tpu.memory_space<vmem>>, vector<1x512xf32>
    %cst_12 = arith.constant dense<0.000000e+00> : vector<512xf32>
    %16 = vector.multi_reduction <add>, %9, %cst_12 [0] : vector<2x512xf32> to vector<512xf32>
    %17 = vector.shape_cast %16 : vector<512xf32> to vector<1x512xf32>
    %18 = arith.addf %15, %17 : vector<1x512xf32>
    %c0_13 = arith.constant 0 : index
    %c0_14 = arith.constant 0 : index
    %19 = vector.load %arg6[%c0_13, %c0_14] : memref<1x512xf32, #tpu.memory_space<vmem>>, vector<1x512xf32>
    tpu.vector_store %arg6[%c0_13, %c0_14], %18 {strides = array<i32>} : memref<1x512xf32, #tpu.memory_space<vmem>>, vector<1x512xf32>,
    %c0_i32_15 = arith.constant 0 : i32
    %20 = arith.cmpi eq, %arg1, %c0_i32_15 : i32
    %21 = arith.extui %20 : i1 to i32
    %c0_i32_16 = arith.constant 0 : i32
    %22 = arith.cmpi ne, %21, %c0_i32_16 : i32
    scf.if %22 {
      %c0_17 = arith.constant 0 : index
      %c0_18 = arith.constant 0 : index
      %23 = vector.load %arg5[%c0_17, %c0_18] : memref<1x512xf32, #tpu.memory_space<vmem>>, vector<1x512xf32>
      %24 = vector.shape_cast %23 : vector<1x512xf32> to vector<1x1x512xf32>
      %cst_19 = arith.constant dense<0.000000e+00> : vector<1xf32>
      %25 = vector.multi_reduction <add>, %24, %cst_19 [1, 2] : vector<1x1x512xf32> to vector<1xf32>
      %26 = vector.shape_cast %25 : vector<1xf32> to vector<1x1x1xf32>
      %27 = vector.extract %26[0, 0, 0] : f32 from vector<1x1x1xf32>
      %c0_20 = arith.constant 0 : index
      %c0_21 = arith.constant 0 : index
      %28 = vector.load %arg6[%c0_20, %c0_21] : memref<1x512xf32, #tpu.memory_space<vmem>>, vector<1x512xf32>
      %29 = vector.shape_cast %28 : vector<1x512xf32> to vector<1x1x512xf32>
      %cst_22 = arith.constant dense<0.000000e+00> : vector<1xf32>
      %30 = vector.multi_reduction <add>, %29, %cst_22 [1, 2] : vector<1x1x512xf32> to vector<1xf32>
      %31 = vector.shape_cast %30 : vector<1xf32> to vector<1x1x1xf32>
      %32 = vector.extract %31[0, 0, 0] : f32 from vector<1x1x1xf32>
      %cst_23 = arith.constant 1.000000e+00 : f32
      %33 = arith.addf %27, %cst_23 : f32
      %cst_24 = arith.constant 2.000000e+00 : f32
      %34 = arith.mulf %cst_24, %33 : f32
      %cst_25 = arith.constant 1.000000e+00 : f32
      %35 = arith.addf %32, %cst_25 : f32
      %36 = arith.divf %34, %35 : f32
      %37 = vector.broadcast %36 : f32 to vector<1x1x128xf32>
      %c0_26 = arith.constant 0 : index
      %c0_27 = arith.constant 0 : index
      %c0_28 = arith.constant 0 : index
      %38 = vector.load %arg4[%c0_26, %c0_27, %c0_28] : memref<1x1x128xf32, #tpu.memory_space<vmem>>, vector<1x1x128xf32>
      tpu.vector_store %arg4[%c0_26, %c0_27, %c0_28], %37 {strides = array<i32>} : memref<1x1x128xf32, #tpu.memory_space<vmem>>, vector<1x1x128xf32>,
    } else {
    }
    return
  }
  func.func @transform_0(%arg0: i32, %arg1: i32) -> (i32, i32, i32) {
    %c0_i32 = arith.constant 0 : i32
    %c0_i32_0 = arith.constant 0 : i32
    return %arg0, %arg1, %c0_i32 : i32, i32, i32
  }
  func.func @transform_1(%arg0: i32, %arg1: i32) -> (i32, i32, i32) {
    %c0_i32 = arith.constant 0 : i32
    %c0_i32_0 = arith.constant 0 : i32
    return %arg0, %arg1, %c0_i32 : i32, i32, i32
  }
  func.func @transform_2(%arg0: i32, %arg1: i32) -> (i32, i32, i32) {
    %c0_i32 = arith.constant 0 : i32
    %c0_i32_0 = arith.constant 0 : i32
    %c0_i32_1 = arith.constant 0 : i32
    return %arg0, %c0_i32, %c0_i32_0 : i32, i32, i32
  }
}

</mosaic_0001>

<bundles_post_ra>
// kernel: dice_loss.1
= control target key start
LH: loop header
LB: loop body
LE: loop exit
PB: predicated region body
PF: predicated region fallthrough
CT: control target
= control target key end

     0   :  { %s580_s9 = smov 0   ;;  %s582_s10 = smov 0   ;;  %s656_s0 = inlined_call_operand.vmem [shape: f32[2,2,512], index: 0, kind: input, shape index: {}]   ;;  %s657_s1 = inlined_call_operand.vmem [shape: s8[2,2,512], index: 1, kind: input, shape index: {}]   ;;  %s658_s2 = inlined_call_operand.vmem [shape: f32[2,1,128], index: 2, kind: output, shape index: {}]  }
   0x1   :  { %s584_s11 = smov 0  }
   0x2 LB: > { %s24_s12 = sadd.s32 1, %s558_s10  ;;  %p500_p0 = scmp.ge.s32.totalorder %s562_s11, 1  ;;  %s562_s11 = sphi %s584_s11, %s12_s11   ;;  %s558_s10 = sphi %s582_s10, %s662_s10   ;;  %s554_s9 = sphi %s580_s9, %s661_s9  }
   0x3   : > { %p26_p1 = scmp.ge.s32.totalorder %s24_s12, 2  ;;  %p145_p2 = scmp.lt.s32.totalorder %s562_s11, 3 }
   0x5   : > { %s664_s12 = smov (%p26_p1, %s24_s12), 0  ;;  %p146_p3 = pnand %p500_p0, %p145_p2 }
   0x6   : > { %p177_p4 = scmp.lt.s32.totalorder (!%p146_p3), %s554_s9, 1 }
   0x7   : > { %149 = sbr.rel (%p146_p3) target bundleno = 336 (0x150), region = 28 }
   0xc   : > { %v201_v0 = vlaneseq  ;;  %s666_s9 = smov (!%p177_p4, %s554_s9), 1  ;;  %v564_v2 = vmov 0.0   ;;  %vm218_vm1 = vcmask 1041408   ;;  %vm220_vm2 = vcmask 1045508  }
   0xd   : > { %s503_s13 = sshll.u32 %s666_s9, 2  ;;  %s506_s17 = sshll.u32 %s666_s9, 3  ;;  %vm222_vm3 = vcmask 1043456   ;;  %vm273_vm4 = vcmask 1040384   ;;  %vm275_vm5 = vcmask 1042434  }
   0xe   : > { %vm600_vm0 = vcmp.lt.s32.totalorder %v201_v0, 512  ;;  %s193_s16 = scalar_lea.vmem %s657_s1, %s503_s13  ;;  %s185_s20 = scalar_lea.vmem %s656_s0, %s506_s17 }
   0xf   : > { %205 = vst.msk [vmem:[#allocation2] sm:$0xf] %vm600_vm0, %v564_v2  ;;  %v208_v3 = vld [vmem:[%s193_s16] sm:$0xf]  ;;  %s196_s29 = scalar_lea.vmem %s658_s2, %s666_s9 }
  0x10   : > { %206 = vst.msk [vmem:[#allocation3] sm:$0xf] %vm600_vm0, %v564_v2  ;;  %v209_v4 = vunpack.c.0.s8 %v208_v3  ;;  %v210_v5 = vunpack.c.1.s8 %v208_v3  ;;  %v207_v11 = vld [vmem:[%s185_s20] sm:$0xff] }
  0x12   : > { %v211_v6 = vcvt.s32.f32 %v209_v4  ;;  %v212_v7 = vcvt.s32.f32 %v210_v5 }
  0x14   : > { %v215_v8 = vrot.slane %v211_v6, 2  ;;  %v216_v9 = vrot.slane %v212_v7, 4  ;;  %v217_v10 = vrot.slane %v212_v7, 6 }
  0x16   : > { %v219_v12 = vsel %vm218_vm1, %v211_v6, %v215_v8  ;;  %v221_v13 = vsel %vm220_vm2, %v216_v9, %v217_v10  ;;  %v227_v0 = vld [vmem:[#allocation2] sm:$0xf] }
  0x17   : > { %v223_v14 = vsel %vm222_vm3, %v219_v12, %v221_v13 }
  0x18   : > { %v225_v15 = vmul.f32 %v223_v14, %v207_v11  ;;  %v226_v16 = vadd.f32 %v223_v14, %v207_v11 }
  0x1a   : > { %229 = vst [vmem:[#allocation1] ss:$4 sm:$0xff] %v225_v15 }
  0x21   : > { %v230_v17 = vld.sshfl [vmem:[#allocation1] sm:$0xff pattern:$0x73625140]  ;;  %v231_v18 = vld.sshfl [vmem:[#allocation1 + $0x8] sm:$0xff pattern:$0x73625140] }
  0x22   : > { %v232_v19 = vld.sshfl [vmem:[#allocation1 + $0x10] sm:$0xff pattern:$0x73625140]  ;;  %v233_v20 = vld.sshfl [vmem:[#allocation1 + $0x18] sm:$0xff pattern:$0x73625140] }
  0x23   : > { %v238_v21 = vsel %vm218_vm1, %v230_v17, 0.0  ;;  %v245_v22 = vsel %vm218_vm1, %v231_v18, 0.0  ;;  %v252_v23 = vsel %vm218_vm1, %v232_v19, 0.0  ;;  %v259_v24 = vsel %vm218_vm1, %v233_v20, 0.0  ;;  %287 = vst [vmem:[#allocation1] ss:$4 sm:$0xff] %v226_v16 }
  0x24   : > { %v239_v25 = vrot.slane %v238_v21, 4  ;;  %v246_v26 = vrot.slane %v245_v22, 4  ;;  %v253_v27 = vrot.slane %v252_v23, 4  ;;  %v260_v28 = vrot.slane %v259_v24, 4 }
  0x26   : > { %v240_v29 = vadd.f32 %v239_v25, %v238_v21  ;;  %v247_v30 = vadd.f32 %v246_v26, %v245_v22  ;;  %v254_v31 = vadd.f32 %v253_v27, %v252_v23  ;;  %v261_v32 = vadd.f32 %v260_v28, %v259_v24 }
  0x28   : > { %v241_v33 = vrot.slane %v240_v29, 2  ;;  %v248_v34 = vrot.slane %v247_v30, 2  ;;  %v255_v35 = vrot.slane %v254_v31, 2  ;;  %v262_v36 = vrot.slane %v261_v32, 2 }
  0x2a   : > { %v242_v37 = vadd.f32 %v241_v33, %v240_v29  ;;  %v249_v38 = vadd.f32 %v248_v34, %v247_v30  ;;  %v256_v39 = vadd.f32 %v255_v35, %v254_v31  ;;  %v263_v40 = vadd.f32 %v262_v36, %v261_v32  ;;  %v288_v41 = vld.sshfl [vmem:[#allocation1] sm:$0xff pattern:$0x73625140]  ;;  %v289_v42 = vld.sshfl [vmem:[#allocation1 + $0x8] sm:$0xff pattern:$0x73625140] }
  0x2b   : > { %v290_v43 = vld.sshfl [vmem:[#allocation1 + $0x10] sm:$0xff pattern:$0x73625140]  ;;  %v291_v44 = vld.sshfl [vmem:[#allocation1 + $0x18] sm:$0xff pattern:$0x73625140] }
  0x2c   : > { %v243_v45 = vrot.slane %v242_v37, 1  ;;  %v250_v46 = vrot.slane %v249_v38, 1  ;;  %v257_v47 = vrot.slane %v256_v39, 1  ;;  %v264_v48 = vrot.slane %v263_v40, 1  ;;  %v285_v35 = vld [vmem:[#allocation3] sm:$0xf] }
  0x2d   : > { %v296_v49 = vsel %vm218_vm1, %v288_v41, 0.0  ;;  %v303_v50 = vsel %vm218_vm1, %v289_v42, 0.0  ;;  %v310_v51 = vsel %vm218_vm1, %v290_v43, 0.0  ;;  %v317_v52 = vsel %vm218_vm1, %v291_v44, 0.0 }
  0x2e   : > { %v244_v53 = vadd.f32 %v243_v45, %v242_v37  ;;  %v251_v54 = vadd.f32 %v250_v46, %v249_v38  ;;  %v258_v55 = vadd.f32 %v257_v47, %v256_v39  ;;  %v265_v56 = vadd.f32 %v264_v48, %v263_v40 }
  0x2f   : > { %v297_v57 = vrot.slane %v296_v49, 4  ;;  %v304_v58 = vrot.slane %v303_v50, 4  ;;  %v311_v59 = vrot.slane %v310_v51, 4  ;;  %v318_v60 = vrot.slane %v317_v52, 4 }
  0x30   : > { %v270_v61 = vrot.slane %v251_v54, 7  ;;  %v271_v62 = vrot.slane %v258_v55, 6  ;;  %v272_v63 = vrot.slane %v265_v56, 5 }
  0x31   : > { %v298_v2 = vadd.f32 %v297_v57, %v296_v49  ;;  %v305_v3 = vadd.f32 %v304_v58, %v303_v50  ;;  %v312_v4 = vadd.f32 %v311_v59, %v310_v51  ;;  %v319_v5 = vadd.f32 %v318_v60, %v317_v52 }
  0x32   : > { %v274_v6 = vsel %vm273_vm4, %v244_v53, %v270_v61  ;;  %v276_v7 = vsel %vm275_vm5, %v271_v62, %v272_v63 }
  0x33   : > { %v277_v8 = vsel %vm218_vm1, %v274_v6, %v276_v7  ;;  %v299_v9 = vrot.slane %v298_v2, 2  ;;  %v306_v10 = vrot.slane %v305_v3, 2  ;;  %v313_v11 = vrot.slane %v312_v4, 2 }
  0x34   : > { %v279_v12 = vadd.f32 %v277_v8, %v227_v0  ;;  %v320_v13 = vrot.slane %v319_v5, 2 }
  0x35   : > { %v300_v14 = vadd.f32 %v299_v9, %v298_v2  ;;  %v307_v15 = vadd.f32 %v306_v10, %v305_v3  ;;  %v314_v16 = vadd.f32 %v313_v11, %v312_v4 }
  0x36   : > { %284 = vst.msk [vmem:[#allocation2] sm:$0xf] %vm600_vm0, %v279_v12  ;;  %v321_v17 = vadd.f32 %v320_v13, %v319_v5 }
  0x37   : > { %v301_v18 = vrot.slane %v300_v14, 1  ;;  %v308_v19 = vrot.slane %v307_v15, 1  ;;  %v315_v20 = vrot.slane %v314_v16, 1 }
  0x38   : > { %v322_v21 = vrot.slane %v321_v17, 1 }
  0x39   : > { %v302_v22 = vadd.f32 %v301_v18, %v300_v14  ;;  %v309_v23 = vadd.f32 %v308_v19, %v307_v15  ;;  %v316_v24 = vadd.f32 %v315_v20, %v314_v16 }
  0x3a   : > { %v323_v25 = vadd.f32 %v322_v21, %v321_v17 }
  0x3b   : > { %v328_v26 = vrot.slane %v309_v23, 7  ;;  %v329_v27 = vrot.slane %v316_v24, 6 }
  0x3c   : > { %v330_v28 = vrot.slane %v323_v25, 5 }
  0x3d   : > { %v340_v29 = vld [vmem:[#allocation2] sm:$0xf]  ;;  %v331_v30 = vsel %vm273_vm4, %v302_v22, %v328_v26 }
  0x3e   : > { %v342_v31 = vperm.slane %v340_v29, 0  ;;  %v343_v32 = vperm.slane %v340_v29, 1  ;;  %v344_v33 = vperm.slane %v340_v29, 2  ;;  %v345_v34 = vperm.slane %v340_v29, 3 }
  0x3f   : > { %v332_v36 = vsel %vm275_vm5, %v329_v27, %v330_v28 }
  0x40   : > { %v350_v37 = vsel %vm273_vm4, %v342_v31, 0.0  ;;  %v351_v38 = vsel %vm273_vm4, %v343_v32, 0.0  ;;  %v353_v39 = vsel %vm273_vm4, %v344_v33, 0.0  ;;  %v333_v41 = vsel %vm218_vm1, %v331_v30, %v332_v36 }
  0x41   : > { %v352_v40 = vadd.f32 %v351_v38, %v350_v37  ;;  %v355_v42 = vsel %vm273_vm4, %v345_v34, 0.0  ;;  %v335_v43 = vadd.f32 %v333_v41, %v285_v35 }
  0x43   : > { %v354_v44 = vadd.f32 %v353_v39, %v352_v40  ;;  %336 = vst.msk [vmem:[#allocation3] sm:$0xf] %vm600_vm0, %v335_v43 }
  0x45   : > { %v356_v45 = vadd.f32 %v355_v42, %v354_v44 }
  0x47   : > { %357 = vadd.xlane.f32.xlu0 %v356_v45 }
  0x4a   : > { %v366_v46 = vld [vmem:[#allocation3] sm:$0xf] }
  0x4b   : > { %v368_v47 = vperm.slane %v366_v46, 0  ;;  %v369_v48 = vperm.slane %v366_v46, 1  ;;  %v370_v49 = vperm.slane %v366_v46, 2  ;;  %v371_v50 = vperm.slane %v366_v46, 3 }
  0x4d   : > { %v376_v51 = vsel %vm273_vm4, %v368_v47, 0.0  ;;  %v377_v52 = vsel %vm273_vm4, %v369_v48, 0.0  ;;  %v379_v53 = vsel %vm273_vm4, %v370_v49, 0.0  ;;  %v381_v55 = vsel %vm273_vm4, %v371_v50, 0.0 }
  0x4e   : > { %v378_v54 = vadd.f32 %v377_v52, %v376_v51 }
  0x50   : > { %v380_v56 = vadd.f32 %v379_v53, %v378_v54 }
  0x52   : > { %v382_v57 = vadd.f32 %v381_v55, %v380_v56 }
  0x54   : > { %383 = vadd.xlane.f32.xlu0 %v382_v57 }
  0xba   : > { %v358_v1 = vpop.xlane.xlu0 %357 }
  0xbb   : > { %v359_v58 = vrot.slane %v358_v1, 4 }
  0xbd   : > { %v360_v59 = vadd.f32 %v359_v58, %v358_v1 }
  0xbf   : > { %v361_v60 = vrot.slane %v360_v59, 2 }
  0xc1   : > { %v362_v61 = vadd.f32 %v361_v60, %v360_v59 }
  0xc3   : > { %v363_v62 = vrot.slane %v362_v61, 1 }
  0xc5   : > { %v364_v63 = vadd.f32 %v363_v62, %v362_v61 }
  0xc7   : > { %507 = vpush %v364_v63  ;;  %v384_v0 = vpop.xlane.xlu0 %383 }
  0xc8   : > { %v385_v2 = vrot.slane %v384_v0, 4 }
  0xca   : > { %v386_v3 = vadd.f32 %v385_v2, %v384_v0 }
  0xcc   : > { %v387_v4 = vrot.slane %v386_v3, 2 }
  0xce   : > { %v388_v5 = vadd.f32 %v387_v4, %v386_v3 }
  0xd0   : > { %v389_v6 = vrot.slane %v388_v5, 1 }
  0xd2   : > { %v390_v7 = vadd.f32 %v389_v6, %v388_v5 }
  0xd4   : > { %509 = vpush %v390_v7 }
  0xf8   : > { %s508_s21 = spop %507 }
  0xf9   : > { %s392_s24 = sadd.f32 1.0, %s508_s21 }
  0xfb   : > { %s393_s25 = smul.f32 2.0, %s392_s24 }
 0x105   : > { %s510_s22 = spop %509 }
 0x106   : > { %s394_s23 = sadd.f32 1.0, %s510_s22 }
 0x108   : > { %v395_v8 = vstv %s394_s23 }
 0x109   : > { %538 = vrcp.f32 %v395_v8  ;;  %v407_v12 = vand.u32 2147483648, %v395_v8  ;;  %v405_v14 = vand.u32 2147483647, %v395_v8  ;;  %vm401_vm7 = vweird.f32 %v395_v8 }
 0x10b   : > { %v408_v16 = vor.u32 1.1754944e-38, %v407_v12  ;;  %vm406_vm9 = vcmp.eq.f32.partialorder %v405_v14, 8.507059e+37 }
 0x10f   : > { %v539_v9 = vpop.eup %538 }
 0x110   : > { %v397_v10 = vmul.f32 %v539_v9, %v395_v8  ;;  %vm402_vm6 = vweird.f32 %v539_v9 }
 0x111   : > { %vm403_vm8 = vmor %vm401_vm7, %vm402_vm6 }
 0x112   : > { %v398_v11 = vsub.f32 1.0, %v397_v10 }
 0x114   : > { %v399_v13 = vmul.f32 %v539_v9, %v398_v11 }
 0x116   : > { %v400_v15 = vadd.f32 %v539_v9, %v399_v13 }
 0x118   : > { %v404_v17 = vsel %vm403_vm8, %v539_v9, %v400_v15 }
 0x119   : > { %v409_v18 = vsel %vm406_vm9, %v408_v16, %v404_v17 }
 0x11a   : > { %511 = vpush %v409_v18 }
 0x14b   : > { %s512_s26 = spop %511 }
 0x14c   : > { %s411_s30 = smul.f32 %s512_s26, %s393_s25 }
 0x14e   : > { %v412_v19 = vstv %s411_s30 }
 0x14f   : > { %413 = vst [vmem:[%s196_s29] sm:$0x1] %v412_v19 }
 0x150 PF: > { %s12_s11 = sadd.s32 1, %s562_s11   ;;  %s661_s9 = smov %s558_s10 }
 0x151   : > { %p9_p5 = scmp.ge.s32.totalorder %s12_s11, 4   ;;  %s662_s10 = smov %s664_s12 }
 0x153   :  { %11 = sbr.rel (!%p9_p5) target bundleno = 2 (0x2), region = 69 }

</bundles_post_ra>
